<compile_context>
chip_gen: v6e
topology: v6e:2x2x1
jax: 0.10.0
libtpu: 0.0.40
codegen_flags: <defaults>
</compile_context>

<pallas_src>
import functools
import math

import jax
import jax.numpy as jnp
from jax.experimental import pallas as pl
from jax.experimental.pallas import tpu as pltpu


INPUT_SIZE = 4
HIDDEN_SIZE = 16
OUTPUT_SIZE = 16
_CAT = 2 * HIDDEN_SIZE            # 32 = [target hidden | predictor hidden] per batch row
PACK = 8                          # batch rows lane-packed per kernel row

_IN_COLS = PACK * INPUT_SIZE      # 32  lanes of packed input
_LANES = PACK * _CAT              # 256 lanes of packed hidden / fused output
_OUT_COLS = PACK * OUTPUT_SIZE    # 128 lanes per (target | predictor) output slab

# Packed parameter buffer row layout. Every sub-array starts on a sublane
# multiple of 8; buffer is (8,128)-aligned so it moves as one lane-dense DMA.
_W1_ROW = 0                       # rows   0:32  -> W1_big  (32, 256)
_B1_ROW = 32                      # row   32     -> b1_big  (1, 256)
_W2_ROW = 40                      # rows  40:296 -> W2_big  (256, 256)
_B2_ROW = 296                     # row  296     -> b2_big  (1, 256)
_PACK_ROWS = 304                  # multiple of 8
_PACK_COLS = _LANES               # 256


def _rnd_kernel(x_ref, p_ref, out_t_ref, out_p_ref):
    x = x_ref[...]                                                  # (tb, 32)

    w1 = p_ref[_W1_ROW:_W1_ROW + _IN_COLS, :]                       # (32, 256)
    b1 = p_ref[_B1_ROW:_B1_ROW + 1, :]                              # (1, 256)
    w2 = p_ref[_W2_ROW:_W2_ROW + _LANES, :]                         # (256, 256)
    b2 = p_ref[_B2_ROW:_B2_ROW + 1, :]                              # (1, 256)

    # Fused first layer for both nets x 8 packed rows, single LeakyReLU.
    # TODO(synk): if a bundle dump ever shows the K=32 matmul on the critical
    # path, replace it with unrolled rank-1 VPU updates; left on MXU for now.
    h = jnp.dot(x, w1, preferred_element_type=jnp.float32) + b1
    h = jnp.where(h >= 0, h, jnp.float32(0.01) * h)

    # Fused second layer; columns are pre-permuted so lanes 0:128 are target
    # outputs and lanes 128:256 are predictor outputs -> both stores lane-dense.
    y = jnp.dot(h, w2, preferred_element_type=jnp.float32) + b2     # (tb, 256)
    out_t_ref[...] = y[:, :_OUT_COLS]
    out_p_ref[...] = y[:, _OUT_COLS:]


def pack_rnd_params(params):
    """Pack all 8 parameter arrays into one (304,256) f32, (8,128)-aligned buffer."""
    w1_cat = jnp.concatenate([params["w1_t"], params["w1_p"]], axis=1)   # (4, 32)
    b1_cat = jnp.concatenate([params["b1_t"], params["b1_p"]], axis=0)   # (32,)

    w1_big = jnp.zeros((_IN_COLS, _LANES), jnp.float32)                  # (32, 256)
    w2_big = jnp.zeros((_LANES, _LANES), jnp.float32)                    # (256, 256)
    b2_big = jnp.zeros((_LANES,), jnp.float32)
    for k in range(PACK):
        # Layer 1: block-diagonal copies of the fused [w1_t | w1_p].
        w1_big = w1_big.at[k * INPUT_SIZE:(k + 1) * INPUT_SIZE,
                           k * _CAT:(k + 1) * _CAT].set(w1_cat)
        # Layer 2: hidden slot k (rows 32k:32k+32) -> target cols 16k:16k+16,
        # predictor cols 128+16k:128+16k+16 (column-permuted block diagonal).
        w2_big = w2_big.at[k * _CAT:k * _CAT + HIDDEN_SIZE,
                           k * OUTPUT_SIZE:(k + 1) * OUTPUT_SIZE].set(params["w2_t"])
        w2_big = w2_big.at[k * _CAT + HIDDEN_SIZE:(k + 1) * _CAT,
                           _OUT_COLS + k * OUTPUT_SIZE:
                           _OUT_COLS + (k + 1) * OUTPUT_SIZE].set(params["w2_p"])
        b2_big = b2_big.at[k * OUTPUT_SIZE:(k + 1) * OUTPUT_SIZE].set(params["b2_t"])
        b2_big = b2_big.at[_OUT_COLS + k * OUTPUT_SIZE:
                           _OUT_COLS + (k + 1) * OUTPUT_SIZE].set(params["b2_p"])
    b1_big = jnp.tile(b1_cat, PACK)                                      # (256,)

    packed = jnp.zeros((_PACK_ROWS, _PACK_COLS), jnp.float32)
    packed = packed.at[_W1_ROW:_W1_ROW + _IN_COLS, :].set(w1_big)
    packed = packed.at[_B1_ROW, :].set(b1_big)
    packed = packed.at[_W2_ROW:_W2_ROW + _LANES, :].set(w2_big)
    packed = packed.at[_B2_ROW, :].set(b2_big)
    return packed


def _round_up(n, m):
    return ((n + m - 1) // m) * m


def _choose_tile(bp, block_b):
    """Batch tile (in packed rows): multiple of 8, and >=2 grid steps when possible
    so the 'parallel' axis can shard across v7x's two TensorCores."""
    if bp <= 8:
        return bp                      # full extent; legal even if < 8
    half = _round_up(pl.cdiv(bp, 2), 8)
    return min(_round_up(min(block_b, half), 8), _round_up(bp, 8))


@functools.partial(jax.jit, static_argnames=("block_b",))
def rnd_forward(x, packed_params, block_b=2048):
    """x: (B, INPUT_SIZE) f32. packed_params: output of pack_rnd_params.

    Returns (target_out, predictor_out), each (B, OUTPUT_SIZE) f32.
    block_b is the tile size in *packed* rows (8 batch rows each); sweep 1024-4096.
    """
    B = x.shape[0]
    b_pad = _round_up(B, PACK)
    if b_pad != B:
        x = jnp.pad(x, ((0, b_pad - B), (0, 0)))
    bp = b_pad // PACK
    xp = x.reshape(bp, _IN_COLS)                 # free row-major reshape

    tb = _choose_tile(bp, block_b)

    out_t, out_p = pl.pallas_call(
        _rnd_kernel,
        out_shape=(jax.ShapeDtypeStruct((bp, _OUT_COLS), jnp.float32),
                   jax.ShapeDtypeStruct((bp, _OUT_COLS), jnp.float32)),
        grid=(pl.cdiv(bp, tb),),
        in_specs=[
            # Batch-blocked packed-input tile.
            pl.BlockSpec((tb, _IN_COLS), lambda i: (i, 0)),
            # Single packed parameter buffer, resident across all grid steps.
            pl.BlockSpec((_PACK_ROWS, _PACK_COLS), lambda i: (0, 0)),
        ],
        out_specs=(
            pl.BlockSpec((tb, _OUT_COLS), lambda i: (i, 0)),
            pl.BlockSpec((tb, _OUT_COLS), lambda i: (i, 0)),
        ),
        compiler_params=pltpu.CompilerParams(
            dimension_semantics=("parallel",),
            # Allow large batch tiles on v5e's 16 MiB scoped default; stays well
            # under v7x's 64 MiB physical VMEM.
            vmem_limit_bytes=32 * 1024 * 1024),
    )(xp, packed_params)

    # Free row-major reshapes back to per-row outputs (no lane shuffling needed:
    # lanes 0:128 of out_t / out_p are already the 8 packed rows in order).
    t = out_t.reshape(b_pad, OUTPUT_SIZE)
    p = out_p.reshape(b_pad, OUTPUT_SIZE)
    if b_pad != B:
        t, p = t[:B], p[:B]
    return t, p


def init_rnd_params(key, input_size=INPUT_SIZE, hidden_size=HIDDEN_SIZE,
                    output_size=OUTPUT_SIZE):
    """Parameter init matching the PyTorch module.

    Target net: weights ~ N(0, 1), biases = 0.
    Predictor net: PyTorch default Linear init (uniform +-1/sqrt(fan_in)).
    Weights stored transposed: (in_features, out_features).
    """
    ks = jax.random.split(key, 6)

    # target net
    w1_t = jax.random.normal(ks[0], (input_size, hidden_size), jnp.float32)
    b1_t = jnp.zeros((hidden_size,), jnp.float32)
    w2_t = jax.random.normal(ks[1], (hidden_size, output_size), jnp.float32)
    b2_t = jnp.zeros((output_size,), jnp.float32)

    # predictor net
    lim1 = 1.0 / math.sqrt(input_size)
    lim2 = 1.0 / math.sqrt(hidden_size)
    w1_p = jax.random.uniform(ks[2], (input_size, hidden_size), jnp.float32,
                              minval=-lim1, maxval=lim1)
    b1_p = jax.random.uniform(ks[3], (hidden_size,), jnp.float32,
                              minval=-lim1, maxval=lim1)
    w2_p = jax.random.uniform(ks[4], (hidden_size, output_size), jnp.float32,
                              minval=-lim2, maxval=lim2)
    b2_p = jax.random.uniform(ks[5], (output_size,), jnp.float32,
                              minval=-lim2, maxval=lim2)

    return dict(w1_t=w1_t, b1_t=b1_t, w2_t=w2_t, b2_t=b2_t,
                w1_p=w1_p, b1_p=b1_p, w2_p=w2_p, b2_p=b2_p)


def _reference_forward(x, p):
    def leaky(v):
        return jnp.where(v >= 0, v, 0.01 * v)

    t = leaky(x @ p["w1_t"] + p["b1_t"]) @ p["w2_t"] + p["b2_t"]
    q = leaky(x @ p["w1_p"] + p["b1_p"]) @ p["w2_p"] + p["b2_p"]
    return t, q


if __name__ == "__main__":
    key = jax.random.PRNGKey(0)
    k_params, k_x1, k_x2 = jax.random.split(key, 3)

    params = init_rnd_params(k_params)
    packed = pack_rnd_params(params)

    # Small primary check (batch = 8 -> one packed row, single grid step).
    batch = 8
    x = jax.random.normal(k_x1, (batch, INPUT_SIZE), jnp.float32)
    target_out, predictor_out = rnd_forward(x, packed)
    jax.block_until_ready((target_out, predictor_out))

    t_ref, p_ref = _reference_forward(x, params)
    assert target_out.shape == (batch, OUTPUT_SIZE)
    assert predictor_out.shape == (batch, OUTPUT_SIZE)
    assert jnp.allclose(target_out, t_ref, atol=1e-5, rtol=1e-5)
    assert jnp.allclose(predictor_out, p_ref, atol=1e-5, rtol=1e-5)

    # Secondary check: multi-step grid + trailing partial block + pad path.
    batch2 = 203  # not a multiple of PACK; packed rows = 26 -> grid of 2 blocks
    x2 = jax.random.normal(k_x2, (batch2, INPUT_SIZE), jnp.float32)
    t2, p2 = rnd_forward(x2, packed)
    jax.block_until_ready((t2, p2))
    t2_ref, p2_ref = _reference_forward(x2, params)
    assert jnp.allclose(t2, t2_ref, atol=1e-5, rtol=1e-5)
    assert jnp.allclose(p2, p2_ref, atol=1e-5, rtol=1e-5)

    print("KERNEL_OK")
</pallas_src>

<mosaic_0001>
module attributes {stable_mosaic.version = 11 : i64} {
  func.func @_rnd_kernel(%arg0: i32, %arg1: memref<1x32xf32, #tpu.memory_space<vmem>>, %arg2: memref<304x256xf32, #tpu.memory_space<vmem>>, %arg3: memref<1x128xf32, #tpu.memory_space<vmem>>, %arg4: memref<1x128xf32, #tpu.memory_space<vmem>>) attributes {dimension_semantics = [#tpu.dimension_semantics<parallel>], iteration_bounds = array<i64: 1>, scalar_prefetch = 0 : i64, scratch_operands = 0 : i64, tpu.core_type = #tpu.core_type<tc>, window_params = [{transform_indices = @transform_0, window_bounds = array<i64: 1, 32>}, {pipeline_mode = #tpu.pipeline_mode<synchronous>, transform_indices = @transform_1, window_bounds = array<i64: 304, 256>}, {transform_indices = @transform_2, window_bounds = array<i64: 1, 128>}, {transform_indices = @transform_3, window_bounds = array<i64: 1, 128>}]} {
    %c0 = arith.constant 0 : index
    %c0_0 = arith.constant 0 : index
    %0 = vector.load %arg1[%c0, %c0_0] : memref<1x32xf32, #tpu.memory_space<vmem>>, vector<1x32xf32>
    %c0_1 = arith.constant 0 : index
    %c0_2 = arith.constant 0 : index
    %1 = vector.load %arg2[%c0_1, %c0_2] : memref<304x256xf32, #tpu.memory_space<vmem>>, vector<32x256xf32>
    %c32 = arith.constant 32 : index
    %c0_3 = arith.constant 0 : index
    %2 = vector.load %arg2[%c32, %c0_3] : memref<304x256xf32, #tpu.memory_space<vmem>>, vector<1x256xf32>
    %c40 = arith.constant 40 : index
    %c0_4 = arith.constant 0 : index
    %3 = vector.load %arg2[%c40, %c0_4] : memref<304x256xf32, #tpu.memory_space<vmem>>, vector<256x256xf32>
    %c296 = arith.constant 296 : index
    %c0_5 = arith.constant 0 : index
    %4 = vector.load %arg2[%c296, %c0_5] : memref<304x256xf32, #tpu.memory_space<vmem>>, vector<1x256xf32>
    %cst = arith.constant dense<0.000000e+00> : vector<1x256xf32>
    %5 = tpu.matmul %0, %1, %cst {dimension_numbers = #tpu.dot_dimension_numbers<[1], [0], [0], [1], [0, 0, 1, 1], [], []>} : vector<1x32xf32>, vector<32x256xf32>, vector<1x256xf32> -> vector<1x256xf32>
    %6 = arith.addf %5, %2 : vector<1x256xf32>
    %cst_6 = arith.constant 0.000000e+00 : f32
    %7 = vector.broadcast %cst_6 : f32 to vector<1x256xf32>
    %8 = arith.cmpf oge, %6, %7 : vector<1x256xf32>
    %cst_7 = arith.constant 0.00999999977 : f32
    %9 = vector.broadcast %cst_7 : f32 to vector<1x256xf32>
    %10 = arith.mulf %9, %6 : vector<1x256xf32>
    %11 = arith.select %8, %6, %10 : vector<1x256xi1>, vector<1x256xf32>
    %cst_8 = arith.constant dense<0.000000e+00> : vector<1x256xf32>
    %12 = tpu.matmul %11, %3, %cst_8 {dimension_numbers = #tpu.dot_dimension_numbers<[1], [0], [0], [1], [0, 0, 1, 1], [], []>} : vector<1x256xf32>, vector<256x256xf32>, vector<1x256xf32> -> vector<1x256xf32>
    %13 = arith.addf %12, %4 : vector<1x256xf32>
    %14 = vector.extract_strided_slice %13 {offsets = [0, 0], sizes = [1, 128], strides = [1, 1]} : vector<1x256xf32> to vector<1x128xf32>
    %c0_9 = arith.constant 0 : index
    %c0_10 = arith.constant 0 : index
    %15 = vector.load %arg3[%c0_9, %c0_10] : memref<1x128xf32, #tpu.memory_space<vmem>>, vector<1x128xf32>
    tpu.vector_store %arg3[%c0_9, %c0_10], %14 {strides = array<i32>} : memref<1x128xf32, #tpu.memory_space<vmem>>, vector<1x128xf32>,
    %16 = vector.extract_strided_slice %13 {offsets = [0, 128], sizes = [1, 128], strides = [1, 1]} : vector<1x256xf32> to vector<1x128xf32>
    %c0_11 = arith.constant 0 : index
    %c0_12 = arith.constant 0 : index
    %17 = vector.load %arg4[%c0_11, %c0_12] : memref<1x128xf32, #tpu.memory_space<vmem>>, vector<1x128xf32>
    tpu.vector_store %arg4[%c0_11, %c0_12], %16 {strides = array<i32>} : memref<1x128xf32, #tpu.memory_space<vmem>>, vector<1x128xf32>,
    return
  }
  func.func @transform_0(%arg0: i32) -> (i32, i32) {
    %c0_i32 = arith.constant 0 : i32
    %c0_i32_0 = arith.constant 0 : i32
    return %arg0, %c0_i32 : i32, i32
  }
  func.func @transform_1(%arg0: i32) -> (i32, i32) {
    %c0_i32 = arith.constant 0 : i32
    %c0_i32_0 = arith.constant 0 : i32
    %c0_i32_1 = arith.constant 0 : i32
    return %c0_i32, %c0_i32_0 : i32, i32
  }
  func.func @transform_2(%arg0: i32) -> (i32, i32) {
    %c0_i32 = arith.constant 0 : i32
    %c0_i32_0 = arith.constant 0 : i32
    return %arg0, %c0_i32 : i32, i32
  }
  func.func @transform_3(%arg0: i32) -> (i32, i32) {
    %c0_i32 = arith.constant 0 : i32
    %c0_i32_0 = arith.constant 0 : i32
    return %arg0, %c0_i32 : i32, i32
  }
}

</mosaic_0001>

<bundles_post_ra>
// kernel: rnd_forward.1
= control target key start
LH: loop header
LB: loop body
LE: loop exit
PB: predicated region body
PF: predicated region fallthrough
CT: control target
= control target key end

     0   :  { %9 = vsyncpa [#allocation3], 0  ;;  %s316_s12 = smov [#allocation2]   ;;  %s352_s0 = inlined_call_operand.vmem [shape: f32[1,32], index: 0, kind: input, shape index: {}]   ;;  %s353_s1 = inlined_call_operand.hbm [shape: f32[304,256], index: 1, kind: input, shape index: {}]   ;;  %s354_s2 = inlined_call_operand.vmem [shape: f32[1,128], index: 2, kind: output, shape index: {0}]   ;;  %s355_s3 = inlined_call_operand.vmem [shape: f32[1,128], index: 3, kind: output, shape index: {1}]  }
   0x1   :  { %s17_s13 = sshll.u32 %s316_s12, 4  ;;  %s18_s13 = int_to_ptr.vmem [resolvable:$true] %s17_s13 }
   0x2   :  { %s302_s14 = scalar_lea.vmem %s18_s13, 9728  ;;  %p307_p1 = scmp.lt.s32.totalorder %s18_s13, %s18_s13 }
   0x3   :  { %p303_p0 = scmp.ne.s32.totalorder %s18_s13, %s302_s14  ;;  %p308_p2 = scmp.lt.s32.totalorder %s302_s14, %s302_s14 }
   0x5   :  { %p309_p3 = por %p308_p2, %p307_p1 }
   0x7   :  { %p310_p4 = pnand %p309_p3, %p303_p0 }
   0x9   :  { %313 = shalt.err (!%p310_p4)
}
   0xa   :  { %s317_s15 = smov 256   ;;  %s318_s16 = smov 16  }
   0xb   :  { %23 = dma.hbm_to_vmem [thread:$0]  %s353_s1, 9728, %s18_s13, [#allocation3], %s317_s15, %s317_s15, %s318_s16  }
   0xc   :  { %314 = dma.done.wait [#allocation3], 9728  }
   0xd   :  { %315 = vsyncadd [#allocation3], 4294957568  ;;  %v319_v0 = vmov 0.0   ;;  %v35_v1 = vld [vmem:[#allocation2 + $0x38] sm:$0xff]  ;;  %v34_v2 = vld [vmem:[#allocation2 + $0x30] sm:$0xff]  ;;  %vm115_vm0 = vcmask 261120  }
   0xe   :  { %183 = vmatprep.mubr.f32.mxu0 %v319_v0  ;;  %v33_v3 = vld [vmem:[#allocation2 + $0x28] sm:$0xff]  ;;  %143 = vmatprep.subr.mxu0 %v35_v1  ;;  %v32_v4 = vld [vmem:[#allocation2 + $0x20] sm:$0xff]  ;;  %v31_v5 = vld [vmem:[#allocation2 + $0x18] sm:$0xff] }
   0xf   :  { %144 = vmatpush1.msra.mxu0 %v34_v2  ;;  %v30_v6 = vld [vmem:[#allocation2 + $0x10] sm:$0xff]  ;;  %v69_v7 = vld [vmem:[#allocation2 + $0x148] sm:$0xff]  ;;  %v68_v8 = vld [vmem:[#allocation2 + $0x140] sm:$0xff] }
  0x10   :  { %145 = vmatprep.subr.mxu0 %v33_v3  ;;  %v67_v9 = vld [vmem:[#allocation2 + $0x138] sm:$0xff]  ;;  %v29_v10 = vld [vmem:[#allocation2 + $0x8] sm:$0xff]  ;;  %207 = vmatprep.subr.mxu1 %v69_v7  ;;  %v66_v11 = vld [vmem:[#allocation2 + $0x130] sm:$0xff] }
  0x11   :  { %146 = vmatpush1.msra.mxu0 %v32_v4  ;;  %v28_v12 = vld [vmem:[#allocation2] sm:$0xff]  ;;  %208 = vmatpush1.msra.mxu1 %v68_v8  ;;  %v65_v13 = vld [vmem:[#allocation2 + $0x128] sm:$0xff]  ;;  %v63_v16 = vld [vmem:[#allocation2 + $0x118] sm:$0xff] }
  0x12   :  { %147 = vmatprep.subr.mxu0 %v31_v5  ;;  %v27_v14 = vld [vmem:[%s352_s0] sm:$0x1]  ;;  %209 = vmatprep.subr.mxu1 %v67_v9  ;;  %v62_v17 = vld [vmem:[#allocation2 + $0x110] sm:$0xff]  ;;  %v61_v18 = vld [vmem:[#allocation2 + $0x108] sm:$0xff] }
  0x13   :  { %148 = vmatpush1.msra.mxu0 %v30_v6  ;;  %v64_v15 = vld [vmem:[#allocation2 + $0x120] sm:$0xff]  ;;  %210 = vmatpush1.msra.mxu1 %v66_v11  ;;  %v59_v20 = vld [vmem:[#allocation2 + $0xf8] sm:$0xff]  ;;  %v58_v21 = vld [vmem:[#allocation2 + $0xf0] sm:$0xff] }
  0x14   :  { %149 = vmatprep.subr.mxu0 %v29_v10  ;;  %211 = vmatprep.subr.mxu1 %v65_v13  ;;  %v60_v19 = vld [vmem:[#allocation2 + $0x100] sm:$0xff]  ;;  %v57_v22 = vld [vmem:[#allocation2 + $0xe8] sm:$0xff]  ;;  %v55_v24 = vld [vmem:[#allocation2 + $0xd8] sm:$0xff]  ;;  %v105_v10 = vlaneseq }
  0x15   :  { %150 = vmatpush1.msra.mxu0 %v28_v12  ;;  %212 = vmatpush1.msra.mxu1 %v64_v15  ;;  %v56_v23 = vld [vmem:[#allocation2 + $0xe0] sm:$0xff]  ;;  %v54_v25 = vld [vmem:[#allocation2 + $0xd0] sm:$0xff]  ;;  %v53_v26 = vld [vmem:[#allocation2 + $0xc8] sm:$0xff] }
  0x16   :  { %289 = vmatmul.mubr.msk.f32.vlgmr.msra.gmra.mxu0 %vm115_vm0, %v27_v14  ;;  %213 = vmatprep.subr.mxu1 %v63_v16  ;;  %v52_v27 = vld [vmem:[#allocation2 + $0xc0] sm:$0xff]  ;;  %v51_v28 = vld [vmem:[#allocation2 + $0xb8] sm:$0xff]  ;;  %v50_v29 = vld [vmem:[#allocation2 + $0xb0] sm:$0xff]  ;;  %v106_v11 = vshrl.u32 %v105_v10, 7 }
  0x17   :  { %214 = vmatpush1.msra.mxu1 %v62_v17  ;;  %v49_v30 = vld [vmem:[#allocation2 + $0xa8] sm:$0xff]  ;;  %v48_v31 = vld [vmem:[#allocation2 + $0xa0] sm:$0xff]  ;;  %v47_v32 = vld [vmem:[#allocation2 + $0x98] sm:$0xff] }
  0x18   :  { %215 = vmatprep.subr.mxu1 %v61_v18  ;;  %v46_v33 = vld [vmem:[#allocation2 + $0x90] sm:$0xff]  ;;  %v45_v34 = vld [vmem:[#allocation2 + $0x88] sm:$0xff]  ;;  %v44_v35 = vld [vmem:[#allocation2 + $0x80] sm:$0xff]  ;;  %v107_v12 = vsub.s32 0, %v106_v11  ;;  %v111_v14 = vsub.s32 1, %v106_v11 }
  0x19   :  { %216 = vmatpush1.msra.mxu1 %v60_v19  ;;  %v43_v36 = vld [vmem:[#allocation2 + $0x78] sm:$0xff]  ;;  %v42_v37 = vld [vmem:[#allocation2 + $0x70] sm:$0xff]  ;;  %v41_v38 = vld [vmem:[#allocation2 + $0x68] sm:$0xff] }
  0x1a   :  { %217 = vmatprep.subr.mxu1 %v59_v20  ;;  %v40_v39 = vld [vmem:[#allocation2 + $0x60] sm:$0xff]  ;;  %v39_v40 = vld [vmem:[#allocation2 + $0x58] sm:$0xff]  ;;  %v38_v41 = vld [vmem:[#allocation2 + $0x50] sm:$0xff] }
  0x1b   :  { %218 = vmatpush1.msra.mxu1 %v58_v21  ;;  %v101_v42 = vld [vmem:[#allocation2 + $0x248] sm:$0xff]  ;;  %v100_v43 = vld [vmem:[#allocation2 + $0x240] sm:$0xff]  ;;  %v99_v44 = vld [vmem:[#allocation2 + $0x238] sm:$0xff] }
  0x1c   :  { %219 = vmatprep.subr.mxu1 %v57_v22  ;;  %v98_v45 = vld [vmem:[#allocation2 + $0x230] sm:$0xff]  ;;  %v97_v46 = vld [vmem:[#allocation2 + $0x228] sm:$0xff]  ;;  %v96_v47 = vld [vmem:[#allocation2 + $0x220] sm:$0xff] }
  0x1d   :  { %220 = vmatpush1.msra.mxu1 %v56_v23  ;;  %v95_v48 = vld [vmem:[#allocation2 + $0x218] sm:$0xff]  ;;  %v94_v49 = vld [vmem:[#allocation2 + $0x210] sm:$0xff]  ;;  %v93_v50 = vld [vmem:[#allocation2 + $0x208] sm:$0xff] }
  0x1e   :  { %221 = vmatprep.subr.mxu1 %v55_v24  ;;  %v92_v51 = vld [vmem:[#allocation2 + $0x200] sm:$0xff]  ;;  %v91_v52 = vld [vmem:[#allocation2 + $0x1f8] sm:$0xff]  ;;  %v90_v53 = vld [vmem:[#allocation2 + $0x1f0] sm:$0xff] }
  0x1f   :  { %222 = vmatpush1.msra.mxu1 %v54_v25  ;;  %v89_v54 = vld [vmem:[#allocation2 + $0x1e8] sm:$0xff]  ;;  %v88_v55 = vld [vmem:[#allocation2 + $0x1e0] sm:$0xff]  ;;  %v87_v56 = vld [vmem:[#allocation2 + $0x1d8] sm:$0xff] }
  0x20   :  { %223 = vmatprep.subr.mxu1 %v53_v26  ;;  %v86_v57 = vld [vmem:[#allocation2 + $0x1d0] sm:$0xff]  ;;  %v85_v58 = vld [vmem:[#allocation2 + $0x1c8] sm:$0xff]  ;;  %v84_v59 = vld [vmem:[#allocation2 + $0x1c0] sm:$0xff] }
  0x21   :  { %224 = vmatpush1.msra.mxu1 %v52_v27  ;;  %v83_v60 = vld [vmem:[#allocation2 + $0x1b8] sm:$0xff]  ;;  %v82_v61 = vld [vmem:[#allocation2 + $0x1b0] sm:$0xff]  ;;  %v81_v62 = vld [vmem:[#allocation2 + $0x1a8] sm:$0xff] }
  0x22   :  { %225 = vmatprep.subr.mxu1 %v51_v28  ;;  %v80_v63 = vld [vmem:[#allocation2 + $0x1a0] sm:$0xff]  ;;  %v79_v0 = vld [vmem:[#allocation2 + $0x198] sm:$0xff]  ;;  %v78_v1 = vld [vmem:[#allocation2 + $0x190] sm:$0xff] }
  0x23   :  { %226 = vmatpush1.msra.mxu1 %v50_v29  ;;  %v77_v2 = vld [vmem:[#allocation2 + $0x188] sm:$0xff]  ;;  %v76_v3 = vld [vmem:[#allocation2 + $0x180] sm:$0xff]  ;;  %v75_v4 = vld [vmem:[#allocation2 + $0x178] sm:$0xff] }
  0x24   :  { %227 = vmatprep.subr.mxu1 %v49_v30  ;;  %v74_v5 = vld [vmem:[#allocation2 + $0x170] sm:$0xff]  ;;  %v73_v6 = vld [vmem:[#allocation2 + $0x168] sm:$0xff]  ;;  %v72_v7 = vld [vmem:[#allocation2 + $0x160] sm:$0xff] }
  0x25   :  { %228 = vmatpush1.msra.mxu1 %v48_v31  ;;  %v71_v8 = vld [vmem:[#allocation2 + $0x158] sm:$0xff]  ;;  %v70_v9 = vld [vmem:[#allocation2 + $0x150] sm:$0xff]  ;;  %v37_v13 = vld [vmem:[#allocation2 + $0x40] ss:$8 sm:$0x3] }
  0x26   :  { %229 = vmatprep.subr.mxu1 %v47_v32  ;;  %v108_v15 = vrot.slane %v37_v13, %v107_v12  ;;  %v112_v16 = vrot.slane %v37_v13, %v111_v14  ;;  %v103_v25 = vld [vmem:[#allocation2 + $0x250] ss:$8 sm:$0x3] }
  0x27   :  { %230 = vmatpush1.msra.mxu1 %v46_v33  ;;  %v200_v26 = vrot.slane %v103_v25, %v107_v12  ;;  %v204_v27 = vrot.slane %v103_v25, %v111_v14 }
  0x28   :  { %231 = vmatprep.subr.mxu1 %v45_v34 }
  0x29   :  { %232 = vmatpush1.msra.mxu1 %v44_v35 }
  0x2a   :  { %233 = vmatprep.subr.mxu1 %v43_v36 }
  0x2b   :  { %234 = vmatpush1.msra.mxu1 %v42_v37 }
  0x2c   :  { %235 = vmatprep.subr.mxu1 %v41_v38 }
  0x2d   :  { %236 = vmatpush1.msra.mxu1 %v40_v39 }
  0x2e   :  { %237 = vmatprep.subr.mxu1 %v39_v40 }
  0x2f   :  { %238 = vmatpush1.msra.mxu1 %v38_v41 }
  0x30   :  { %239 = vmatprep.subr.mxu1 %v101_v42 }
  0x31   :  { %240 = vmatpush2.msra.mxu1 %v100_v43 }
  0x32   :  { %241 = vmatprep.subr.mxu1 %v99_v44 }
  0x33   :  { %242 = vmatpush2.msra.mxu1 %v98_v45 }
  0x34   :  { %243 = vmatprep.subr.mxu1 %v97_v46 }
  0x35   :  { %244 = vmatpush2.msra.mxu1 %v96_v47 }
  0x36   :  { %245 = vmatprep.subr.mxu1 %v95_v48 }
  0x37   :  { %246 = vmatpush2.msra.mxu1 %v94_v49 }
  0x38   :  { %247 = vmatprep.subr.mxu1 %v93_v50 }
  0x39   :  { %248 = vmatpush2.msra.mxu1 %v92_v51 }
  0x3a   :  { %249 = vmatprep.subr.mxu1 %v91_v52 }
  0x3b   :  { %250 = vmatpush2.msra.mxu1 %v90_v53 }
  0x3c   :  { %251 = vmatprep.subr.mxu1 %v89_v54 }
  0x3d   :  { %252 = vmatpush2.msra.mxu1 %v88_v55 }
  0x3e   :  { %253 = vmatprep.subr.mxu1 %v87_v56 }
  0x3f   :  { %254 = vmatpush2.msra.mxu1 %v86_v57 }
  0x40   :  { %255 = vmatprep.subr.mxu1 %v85_v58 }
  0x41   :  { %256 = vmatpush2.msra.mxu1 %v84_v59 }
  0x42   :  { %257 = vmatprep.subr.mxu1 %v83_v60 }
  0x43   :  { %258 = vmatpush2.msra.mxu1 %v82_v61 }
  0x44   :  { %259 = vmatprep.subr.mxu1 %v81_v62 }
  0x45   :  { %260 = vmatpush2.msra.mxu1 %v80_v63 }
  0x46   :  { %261 = vmatprep.subr.mxu1 %v79_v0 }
  0x47   :  { %262 = vmatpush2.msra.mxu1 %v78_v1 }
  0x48   :  { %263 = vmatprep.subr.mxu1 %v77_v2 }
  0x49   :  { %264 = vmatpush2.msra.mxu1 %v76_v3 }
  0x4a   :  { %265 = vmatprep.subr.mxu1 %v75_v4 }
  0x4b   :  { %266 = vmatpush2.msra.mxu1 %v74_v5 }
  0x4c   :  { %267 = vmatprep.subr.mxu1 %v73_v6 }
  0x4d   :  { %268 = vmatpush2.msra.mxu1 %v72_v7 }
  0x4e   :  { %269 = vmatprep.subr.mxu1 %v71_v8 }
  0x4f   :  { %270 = vmatpush2.msra.mxu1 %v70_v9 }
  0xd6   :  { %v185_v17 = vpop.f32.mrf.mxu0 }
  0xd7   :  { %v186_v18 = vadd.f32 %v185_v17, %v108_v15 }
  0xd8   :  { %v187_v19 = vpop.f32.mrf.mxu0 }
  0xd9   :  { %v188_v20 = vadd.f32 %v187_v19, %v112_v16  ;;  %v192_v21 = vmul.f32 0.01, %v186_v18  ;;  %vm190_vm2 = vcmp.ge.f32.partialorder %v186_v18, 0.0 }
  0xdb   :  { %vm191_vm1 = vcmp.ge.f32.partialorder %v188_v20, 0.0  ;;  %v193_v22 = vmul.f32 0.01, %v188_v20  ;;  %v194_v24 = vsel %vm190_vm2, %v186_v18, %v192_v21 }
  0xdd   :  { %v195_v23 = vsel %vm191_vm1, %v188_v20, %v193_v22 }
  0xde   :  { %271 = vmatprep.mubr.f32.mxu1 %v195_v23 }
  0xdf   :  { %272 = vmatmul.mubr.f32.vlgmr.msra.gmra.mxu1 %v194_v24 }
 0x19f   :  { %v273_v28 = vpop.f32.mrf.mxu1 }
 0x1a0   :  { %v274_v29 = vadd.f32 %v273_v28, %v200_v26 }
 0x1a1   :  { %v275_v30 = vpop.f32.mrf.mxu1 }
 0x1a2   :  { %278 = vst [vmem:[%s354_s2] sm:$0x1] %v274_v29  ;;  %v276_v31 = vadd.f32 %v275_v30, %v204_v27 }
 0x1a4   :  { %279 = vst [vmem:[%s355_s3] sm:$0x1] %v276_v31 }
 0x1a5   :  { %288 = vsyncpa [#allocation3], 1 }

</bundles_post_ra>
